<compile_context>
chip_gen: v6e
topology: v6e:2x2x1
jax: 0.10.0
libtpu: 0.0.40
codegen_flags: <defaults>
</compile_context>

<pallas_src>
import jax
import jax.numpy as jnp
from jax.experimental import pallas as pl
from jax.experimental.pallas import tpu as pltpu


def _round_up(x, m):
    return ((x + m - 1) // m) * m


def _cdiv(a, b):
    return -(-a // b)


def fused_affine_kernel(x_ref, w_ref, b_ref, o_ref):
    """One batch tile of y = x @ W + b.

    x tile arrives as f32 (as stored in HBM) and is cast to the MXU dtype on the VPU;
    accumulation + bias add stay in f32; the store is bf16 / lane-dense.
    """
    x = x_ref[...].astype(w_ref.dtype)
    acc = jnp.dot(x, w_ref[...], preferred_element_type=jnp.float32)
    o_ref[...] = (acc + b_ref[...]).astype(o_ref.dtype)


def fuse_simple_net_params(w1, b1, w2, b2, w3, b3,
                           mxu_dtype=jnp.bfloat16, lane_multiple=128):
    """Fold the 3 activation-free linears into one affine map, padded lane-dense.

    Returns (w_fused [in_dim, out_pad] in mxu_dtype, b_fused [1, out_pad] f32, out_dim).
    """
    f32 = jnp.float32
    w1, w2, w3 = w1.astype(f32), w2.astype(f32), w3.astype(f32)
    b1, b2, b3 = b1.astype(f32), b2.astype(f32), b3.astype(f32)

    w = (w1 @ w2) @ w3                     # [in_dim, out_dim], exact affine composition
    b = (b1 @ w2 + b2) @ w3 + b3           # [1, out_dim]

    out_dim = w.shape[1]
    out_pad = _round_up(out_dim, lane_multiple)   # keep 128: lane-dense, unmasked stores
    pad = out_pad - out_dim
    w = jnp.pad(w, ((0, 0), (0, pad))).astype(mxu_dtype)
    b = jnp.pad(b.reshape(1, out_dim), ((0, 0), (0, pad))).astype(f32)
    return w, b, out_dim


def _choose_batch_tile(batch, cap=1024, sublane=16):
    """Biggest tile up to `cap`, 16-sublane aligned, grid kept even for v7x's 2 TCs."""
    tb = min(cap, _round_up(max(batch, 1), sublane))
    n_tiles = _cdiv(batch, tb)
    if n_tiles > 1 and n_tiles % 2 == 1:
        n_tiles += 1
        tb = _round_up(_cdiv(batch, n_tiles), sublane)
    return tb


def _pallas_forward(x, w_fused, b_fused, out_dim):
    batch, in_dim = x.shape
    out_pad = w_fused.shape[1]
    tb = _choose_batch_tile(batch)
    grid = (_cdiv(batch, tb),)          # ragged last tile is fine (no batch reduction)

    out = pl.pallas_call(
        fused_affine_kernel,
        out_shape=jax.ShapeDtypeStruct((batch, out_pad), jnp.bfloat16),
        grid_spec=pltpu.PrefetchScalarGridSpec(
            num_scalar_prefetch=0,
            grid=grid,
            in_specs=[
                pl.BlockSpec((tb, in_dim), lambda i: (i, 0)),        # x tile (pipelined, f32)
                pl.BlockSpec((in_dim, out_pad), lambda i: (0, 0)),   # fused W, VMEM-resident
                pl.BlockSpec((1, out_pad), lambda i: (0, 0)),        # fused bias, VMEM-resident
            ],
            out_specs=pl.BlockSpec((tb, out_pad), lambda i: (i, 0)),  # lane-dense bf16 tile
        ),
        compiler_params=pltpu.CompilerParams(
            dimension_semantics=("parallel",)),
    )(x, w_fused, b_fused)

    return out[:, :out_dim].astype(jnp.float32)


def simple_net_forward(x, w_fused, b_fused, out_dim, *, min_pallas_batch=512):
    """y = SimpleNet(x) == x @ w_fused + b_fused.

    Small batches (where the grid would be ~1 and launch overhead dominates) go through
    a plain XLA dot; larger batches use the tiled Pallas kernel.
    """
    if x.shape[0] < min_pallas_batch:
        y = jnp.dot(x.astype(w_fused.dtype), w_fused,
                    preferred_element_type=jnp.float32) + b_fused
        return y[:, :out_dim]
    return _pallas_forward(x, w_fused, b_fused, out_dim)


def init_linear_params(key, in_dim, out_dim, dtype=jnp.float32):
    # Mimics PyTorch nn.Linear's uniform(-1/sqrt(in), 1/sqrt(in)) init; W is stored
    # transposed vs. PyTorch so each layer is x @ W + b (== x @ W_pt.T + b).
    k_w, k_b = jax.random.split(key)
    bound = 1.0 / jnp.sqrt(jnp.float32(in_dim))
    w = jax.random.uniform(k_w, (in_dim, out_dim), dtype, -bound, bound)
    b = jax.random.uniform(k_b, (1, out_dim), dtype, -bound, bound)
    return w, b


if __name__ == "__main__":
    # SimpleNet(in_dim=32, n_hidden_1=64, n_hidden_2=64, out_dim=16), batch=8
    batch, in_dim, n_hidden_1, n_hidden_2, out_dim = 8, 32, 64, 64, 16

    key = jax.random.PRNGKey(0)
    kx, k1, k2, k3 = jax.random.split(key, 4)

    x = jax.random.normal(kx, (batch, in_dim), jnp.float32)
    w1, b1 = init_linear_params(k1, in_dim, n_hidden_1)
    w2, b2 = init_linear_params(k2, n_hidden_1, n_hidden_2)
    w3, b3 = init_linear_params(k3, n_hidden_2, out_dim)

    # One-time offline fold of the three linears into a single lane-dense affine map.
    w_fused, b_fused, od = fuse_simple_net_params(w1, b1, w2, b2, w3, b3)

    # --- Small-batch demo, forced through the Pallas kernel (min_pallas_batch=0). ---
    out = simple_net_forward(x, w_fused, b_fused, od, min_pallas_batch=0)
    out = jax.block_until_ready(out)
    assert out.shape == (batch, out_dim)

    # (1) Exact f32 PyTorch-semantics reference (tolerance sized for bf16 MXU operands
    #     plus the bf16 output store).
    ref_f32 = ((x @ w1 + b1) @ w2 + b2) @ w3 + b3
    assert jnp.allclose(out, ref_f32, atol=5e-2, rtol=5e-2)

    # (2) Matched-precision reference: same bf16 operands / f32 accumulation / bf16 store.
    ref_match = (jnp.dot(x.astype(w_fused.dtype), w_fused,
                         preferred_element_type=jnp.float32)
                 + b_fused).astype(jnp.bfloat16)[:, :od].astype(jnp.float32)
    assert jnp.allclose(out, ref_match, atol=1e-2, rtol=1e-2)

    # (3) Small-batch XLA fallback path (default dispatch) matches the f32 reference.
    out_xla = jax.block_until_ready(simple_net_forward(x, w_fused, b_fused, od))
    assert jnp.allclose(out_xla, ref_f32, atol=5e-2, rtol=5e-2)

    # (4) Larger batch: exercises multi-step grid, the even-grid heuristic (2500 rows ->
    #     4 tiles of 640) and a ragged last tile, via the default Pallas dispatch.
    big_batch = 2500
    xb = jax.random.normal(jax.random.PRNGKey(1), (big_batch, in_dim), jnp.float32)
    out_big = jax.block_until_ready(simple_net_forward(xb, w_fused, b_fused, od))
    ref_big = ((xb @ w1 + b1) @ w2 + b2) @ w3 + b3
    assert out_big.shape == (big_batch, out_dim)
    assert jnp.allclose(out_big, ref_big, atol=5e-2, rtol=5e-2)

    print("KERNEL_OK")
</pallas_src>

<mosaic_0001>
module attributes {stable_mosaic.version = 11 : i64} {
  func.func @fused_affine_kernel(%arg0: i32, %arg1: memref<16x32xf32, #tpu.memory_space<vmem>>, %arg2: memref<32x128xbf16, #tpu.memory_space<vmem>>, %arg3: memref<1x128xf32, #tpu.memory_space<vmem>>, %arg4: memref<16x128xbf16, #tpu.memory_space<vmem>>) attributes {dimension_semantics = [#tpu.dimension_semantics<parallel>], iteration_bounds = array<i64: 1>, scalar_prefetch = 0 : i64, scratch_operands = 0 : i64, tpu.core_type = #tpu.core_type<tc>, window_params = [{transform_indices = @transform_0, window_bounds = array<i64: 16, 32>}, {pipeline_mode = #tpu.pipeline_mode<synchronous>, transform_indices = @transform_1, window_bounds = array<i64: 32, 128>}, {pipeline_mode = #tpu.pipeline_mode<synchronous>, transform_indices = @transform_2, window_bounds = array<i64: 1, 128>}, {transform_indices = @transform_3, window_bounds = array<i64: 16, 128>}]} {
    %c0 = arith.constant 0 : index
    %c0_0 = arith.constant 0 : index
    %0 = vector.load %arg1[%c0, %c0_0] : memref<16x32xf32, #tpu.memory_space<vmem>>, vector<16x32xf32>
    %1 = arith.truncf %0 : vector<16x32xf32> to vector<16x32xbf16>
    %c0_1 = arith.constant 0 : index
    %c0_2 = arith.constant 0 : index
    %2 = vector.load %arg2[%c0_1, %c0_2] : memref<32x128xbf16, #tpu.memory_space<vmem>>, vector<32x128xbf16>
    %cst = arith.constant dense<0.000000e+00> : vector<16x128xf32>
    %3 = tpu.matmul %1, %2, %cst {dimension_numbers = #tpu.dot_dimension_numbers<[1], [0], [0], [1], [0, 0, 1, 1], [], []>} : vector<16x32xbf16>, vector<32x128xbf16>, vector<16x128xf32> -> vector<16x128xf32>
    %c0_3 = arith.constant 0 : index
    %c0_4 = arith.constant 0 : index
    %4 = vector.load %arg3[%c0_3, %c0_4] : memref<1x128xf32, #tpu.memory_space<vmem>>, vector<1x128xf32>
    %5 = vector.broadcast %4 : vector<1x128xf32> to vector<16x128xf32>
    %6 = arith.addf %3, %5 : vector<16x128xf32>
    %7 = arith.truncf %6 : vector<16x128xf32> to vector<16x128xbf16>
    %c0_5 = arith.constant 0 : index
    %c0_6 = arith.constant 0 : index
    %8 = vector.load %arg4[%c0_5, %c0_6] : memref<16x128xbf16, #tpu.memory_space<vmem>>, vector<16x128xbf16>
    tpu.vector_store %arg4[%c0_5, %c0_6], %7 {strides = array<i32>} : memref<16x128xbf16, #tpu.memory_space<vmem>>, vector<16x128xbf16>,
    return
  }
  func.func @transform_0(%arg0: i32) -> (i32, i32) {
    %c0_i32 = arith.constant 0 : i32
    %c0_i32_0 = arith.constant 0 : i32
    return %arg0, %c0_i32 : i32, i32
  }
  func.func @transform_1(%arg0: i32) -> (i32, i32) {
    %c0_i32 = arith.constant 0 : i32
    %c0_i32_0 = arith.constant 0 : i32
    %c0_i32_1 = arith.constant 0 : i32
    return %c0_i32, %c0_i32_0 : i32, i32
  }
  func.func @transform_2(%arg0: i32) -> (i32, i32) {
    %c0_i32 = arith.constant 0 : i32
    %c0_i32_0 = arith.constant 0 : i32
    %c0_i32_1 = arith.constant 0 : i32
    return %c0_i32, %c0_i32_0 : i32, i32
  }
  func.func @transform_3(%arg0: i32) -> (i32, i32) {
    %c0_i32 = arith.constant 0 : i32
    %c0_i32_0 = arith.constant 0 : i32
    return %arg0, %c0_i32 : i32, i32
  }
}

</mosaic_0001>

<bundles_post_ra>
// kernel: tpu_custom_call.1
= control target key start
LH: loop header
LB: loop body
LE: loop exit
PB: predicated region body
PF: predicated region fallthrough
CT: control target
= control target key end

     0   :  { %8 = vsyncpa [#allocation3], 0  ;;  %s291_s0 = inlined_call_operand.hbm [shape: f32[8,32], index: 0, kind: input, shape index: {}]   ;;  %s292_s1 = inlined_call_operand.hbm [shape: bf16[32,128], index: 1, kind: input, shape index: {}]   ;;  %s293_s2 = inlined_call_operand.vmem [shape: f32[1,128], index: 2, kind: input, shape index: {}]   ;;  %s294_s3 = inlined_call_operand.hbm [shape: bf16[8,128], index: 3, kind: output, shape index: {}]  }
   0x1   :  { %9 = vsyncpa [#allocation6], 0 }
   0x2   :  { %10 = vsyncpa [#allocation4], 0 }
   0x3   :  { %15 = vsyncadd [#allocation3], 128  ;;  %s244_s12 = smov [#allocation2]  }
   0x4   :  { %s16_s13 = sshll.u32 %s244_s12, 4  ;;  %s17_s13 = int_to_ptr.vmem [resolvable:$true] %s16_s13 }
   0x5   :  { %s186_s14 = scalar_lea.vmem %s17_s13, 128  ;;  %s190_s15 = scalar_lea.vmem %s17_s13, 256 }
   0x6   :  { %p187_p0 = scmp.ne.s32.totalorder %s17_s13, %s186_s14  ;;  %p191_p1 = scmp.lt.s32.totalorder %s17_s13, %s17_s13 }
   0x7   :  { %p192_p2 = scmp.lt.s32.totalorder %s190_s15, %s186_s14 }
   0x9   :  { %p193_p3 = por %p192_p2, %p191_p1 }
   0xb   :  { %p194_p4 = pnand %p193_p3, %p187_p0 }
   0xd   :  { %197 = shalt.err (!%p194_p4)
}
   0xe   :  { %s245_s16 = smov 128   ;;  %s246_s17 = smov 8  }
   0xf   :  { %22 = dma.hbm_to_vmem [thread:$0]  %s291_s0, 128, %s17_s13, [#allocation3], %s245_s16, %s245_s16, %s246_s17  }
  0x10   :  { %s247_s20 = smov [#allocation5]  }
  0x11   :  { %s28_s21 = sshll.u32 %s247_s20, 4  ;;  %s29_s21 = int_to_ptr.vmem [resolvable:$true] %s28_s21 }
  0x12   :  { %s206_s22 = scalar_lea.vmem %s29_s21, 256  ;;  %p211_p6 = scmp.lt.s32.totalorder %s29_s21, %s29_s21 }
  0x13   :  { %p207_p5 = scmp.ne.s32.totalorder %s29_s21, %s206_s22  ;;  %p212_p7 = scmp.lt.s32.totalorder %s206_s22, %s206_s22 }
  0x15   :  { %p213_p8 = por %p212_p7, %p211_p6 }
  0x17   :  { %p214_p9 = pnand %p213_p8, %p207_p5 }
  0x19   :  { %217 = shalt.err (!%p214_p9)
}
  0x1a   :  { %s248_s23 = smov 64   ;;  %s249_s24 = smov 4  }
  0x1b   :  { %34 = dma.hbm_to_vmem [thread:$0]  %s292_s1, 256, %s29_s21, [#allocation6], %s248_s23, %s248_s23, %s249_s24  }
  0x1c   :  { %238 = dma.done.wait [#allocation3], 256  }
  0x1d   :  { %239 = vsyncadd [#allocation3], 4294967040 }
  0x1e   :  { %240 = dma.done.wait [#allocation6], 256  }
  0x1f   :  { %241 = vsyncadd [#allocation6], 4294967040  ;;  %v250_v0 = vmov 0.0   ;;  %vm251_vm0 = vmmov 0   ;;  %v176_v1 = vld [vmem:[#allocation5 + $0x8] sm:$0xff]   ;;  %v177_v2 = vld [vmem:[#allocation5] sm:$0xff]  }
  0x20   :  { %159 = vmatprep.subr.bf16.mxu0 %v250_v0  ;;  %163 = vmatprep.mubr.msk.bf16.mxu0 %vm251_vm0, %v250_v0  ;;  %v44_v3 = vld [vmem:[#allocation2] sm:$0xff]  ;;  %v45_v4 = vld [vmem:[#allocation2 + $0x8] sm:$0xff]  ;;  %vm70_vm1 = vcmask 261120  }
  0x21   :  { %160 = vmatpush3.bf16.msra.mxu0 %v176_v1  ;;  %v46_v5 = vpack.c.bf16 %v45_v4, %v44_v3  ;;  %v143_v7 = vld [vmem:[%s293_s2] ss:$0 sm:$0xff] }
  0x22   :  { %161 = vmatprep.subr.bf16.mxu0 %v250_v0 }
  0x25   :  { %162 = vmatpush3.bf16.msra.mxu0 %v177_v2 }
  0x28   :  { %164 = vmatmul.mubr.msk.bf16.vlgmr.msra.gmra.mxu0 %vm70_vm1, %v46_v5 }
  0xe8   :  { %v108_v6 = vpop.f32.mrf.mxu0 }
  0xe9   :  { %v109_v10 = vadd.f32 %v143_v7, %v108_v6 }
  0xea   :  { %v165_v8 = vpop.f32.mrf.mxu0 }
  0xec   :  { %v111_v9 = vpop.f32.mrf.mxu0 }
  0xed   :  { %v112_v11 = vadd.f32 %v143_v7, %v111_v9 }
  0xee   :  { %v166_v12 = vpop.f32.mrf.mxu0 }
  0xef   :  { %v154_v13 = vpack.c.bf16 %v112_v11, %v109_v10 }
  0xf1   :  { %155 = vst [vmem:[#allocation7] sm:$0xff] %v154_v13  }
  0xf2   :  { %129 = vsyncadd [#allocation4], 64  ;;  %s252_s27 = smov [#allocation7]  }
  0xf3   :  { %s130_s28 = sshll.u32 %s252_s27, 4  ;;  %s131_s28 = int_to_ptr.vmem [resolvable:$true] %s130_s28 }
  0xf4   :  { %s218_s29 = scalar_lea.vmem %s131_s28, 64  ;;  %s222_s30 = scalar_lea.vmem %s131_s28, 128 }
  0xf5   :  { %p219_p10 = scmp.ne.s32.totalorder %s131_s28, %s218_s29  ;;  %p223_p11 = scmp.lt.s32.totalorder %s131_s28, %s131_s28 }
  0xf6   :  { %p224_p12 = scmp.lt.s32.totalorder %s222_s30, %s218_s29 }
  0xf8   :  { %p225_p13 = por %p224_p12, %p223_p11 }
  0xfa   :  { %p226_p0 = pnand %p225_p13, %p219_p10 }
  0xfc   :  { %229 = shalt.err (!%p226_p0)
}
  0xfd   :  { %136 = dma.vmem_to_hbm [thread:$0]  %s131_s28, 64, %s294_s3, [#allocation4], %s248_s23, %s248_s23, %s249_s24  }
  0xfe   :  { %242 = dma.done.wait [#allocation4], 128  }
  0xff   :  { %243 = vsyncadd [#allocation4], 4294967168 }
 0x100   :  { %140 = vsyncpa [#allocation3], 1 }
 0x101   :  { %141 = vsyncpa [#allocation6], 1 }
 0x102   :  { %142 = vsyncpa [#allocation4], 1 }

</bundles_post_ra>
